<compile_context>
chip_gen: v7x
topology: tpu7x:2x2x1
jax: 0.10.0
libtpu: 0.0.40
codegen_flags: <defaults>
</compile_context>

<pallas_src>
import jax
import jax.numpy as jnp
from jax.experimental import pallas as pl
from jax.experimental.pallas import tpu as pltpu

NEG_SLOPE = 0.1  # LeakyReLU negative slope from the module.


def _round_up(x, m):
    return ((x + m - 1) // m) * m


def _cnn_block_kernel(p_ref, w_ref, scale_ref, shift_ref, o_ref):
    # p_ref:     (tm, Kp)  bf16 patch rows (im2col)
    # w_ref:     (Kp, Ep)  bf16 flattened conv weight
    # scale_ref: (1, Ep)   f32 folded BN scale  (gamma / sqrt(var + eps))
    # shift_ref: (1, Ep)   f32 folded BN shift  (beta - mean * scale)
    acc = jnp.dot(p_ref[...], w_ref[...], preferred_element_type=jnp.float32)
    z = acc * scale_ref[...] + shift_ref[...]
    o_ref[...] = jnp.where(z >= 0, z, NEG_SLOPE * z).astype(o_ref.dtype)


def cnn_block(x, weight, gamma, beta, running_mean, running_var, *,
              stride=(1, 1), padding=(1, 1), eps=1e-5, tm=256):
    """x: (B, C, H, W) NCHW.  weight: (E, C, KH, KW) like nn.Conv2d (no bias).

    Returns LeakyReLU(BatchNorm(Conv2d(x))) in NCHW, eval-mode BN.
    """
    B, C, H, W = x.shape
    E, Cw, KH, KW = weight.shape
    assert Cw == C, (Cw, C)
    sh, sw = stride
    ph, pw = padding

    OH = (H + 2 * ph - KH) // sh + 1
    OW = (W + 2 * pw - KW) // sw + 1
    K = C * KH * KW
    M = B * OH * OW

    # --- im2col glue (plain JAX): (c, kh, kw) fast-axis order, matching the
    #     Conv2d weight layout. ---
    x_pad = jnp.pad(x, ((0, 0), (0, 0), (ph, ph), (pw, pw)))
    cols = []
    for kh in range(KH):
        for kw in range(KW):
            cols.append(
                x_pad[:, :,
                      kh:kh + (OH - 1) * sh + 1:sh,
                      kw:kw + (OW - 1) * sw + 1:sw])            # (B, C, OH, OW)
    patches = jnp.stack(cols, axis=2)                            # (B, C, KH*KW, OH, OW)
    patches = jnp.transpose(patches, (0, 3, 4, 1, 2))            # (B, OH, OW, C, KH*KW)
    patches = patches.reshape(M, K)

    # Conv2d weight (E, C, KH, KW) -> matmul weight (K, E), same (c,kh,kw) order.
    w_mat = weight.reshape(E, K).T

    # Fold eval-mode BatchNorm into per-channel scale / shift (f32).
    inv_std = jax.lax.rsqrt(running_var.astype(jnp.float32) + eps)
    scale = (gamma.astype(jnp.float32) * inv_std).reshape(1, E)
    shift = (beta.astype(jnp.float32)
             - running_mean.astype(jnp.float32) * scale[0]).reshape(1, E)

    # --- lane-dense / tile-aligned padding ---
    Kp = _round_up(K, 128)
    Ep = _round_up(E, 128)
    tm = min(tm, _round_up(M, 128))     # 128-aligned row tile, no bigger than needed
    Mp = _round_up(M, tm)               # pad the M tail instead of dropping it

    patches_p = jnp.pad(patches, ((0, Mp - M), (0, Kp - K))).astype(jnp.bfloat16)
    w_p = jnp.pad(w_mat, ((0, Kp - K), (0, Ep - E))).astype(jnp.bfloat16)
    scale_p = jnp.pad(scale, ((0, 0), (0, Ep - E)), constant_values=1.0)
    shift_p = jnp.pad(shift, ((0, 0), (0, Ep - E)))

    grid = (Mp // tm,)

    out = pl.pallas_call(
        _cnn_block_kernel,
        out_shape=jax.ShapeDtypeStruct((Mp, Ep), jnp.float32),
        grid_spec=pltpu.PrefetchScalarGridSpec(
            num_scalar_prefetch=0,
            grid=grid,
            in_specs=[
                pl.BlockSpec((tm, Kp), lambda i: (i, 0)),
                pl.BlockSpec((Kp, Ep), lambda i: (0, 0),
                             pipeline_mode=pl.Buffered(1)),
                pl.BlockSpec((1, Ep), lambda i: (0, 0),
                             pipeline_mode=pl.Buffered(1)),
                pl.BlockSpec((1, Ep), lambda i: (0, 0),
                             pipeline_mode=pl.Buffered(1)),
            ],
            out_specs=pl.BlockSpec((tm, Ep), lambda i: (i, 0)),
        ),
        compiler_params=pltpu.CompilerParams(
            dimension_semantics=("parallel",),
            vmem_limit_bytes=32 * 1024 * 1024,
        ),
    )(patches_p, w_p, scale_p, shift_p)

    out = out[:M, :E].reshape(B, OH, OW, E)
    return jnp.transpose(out, (0, 3, 1, 2)).astype(x.dtype)


def _reference(x, weight, gamma, beta, running_mean, running_var,
               stride, padding, eps):
    """Pure-JAX reference: conv2d (no bias) + eval-mode BN + LeakyReLU(0.1)."""
    y = jax.lax.conv_general_dilated(
        x, weight,
        window_strides=stride,
        padding=[(padding[0], padding[0]), (padding[1], padding[1])],
        dimension_numbers=("NCHW", "OIHW", "NCHW"))
    mean = running_mean.reshape(1, -1, 1, 1)
    var = running_var.reshape(1, -1, 1, 1)
    g = gamma.reshape(1, -1, 1, 1)
    b = beta.reshape(1, -1, 1, 1)
    y = (y - mean) / jnp.sqrt(var + eps) * g + b
    return jnp.where(y >= 0, y, NEG_SLOPE * y)


if __name__ == "__main__":
    # Small shapes consistent with the module: CNNBlock(4, 32, kernel_size=3,
    # stride=1, padding=1) on a (2, 4, 16, 16) input.
    B, C, H, W = 2, 4, 16, 16
    E, KH, KW = 32, 3, 3
    stride, padding = (1, 1), (1, 1)

    key = jax.random.PRNGKey(0)
    kx, kw, kg, kb, km, kv = jax.random.split(key, 6)
    x = jax.random.normal(kx, (B, C, H, W), dtype=jnp.float32)
    weight = jax.random.normal(kw, (E, C, KH, KW), dtype=jnp.float32) * 0.05
    gamma = 1.0 + 0.1 * jax.random.normal(kg, (E,), dtype=jnp.float32)
    beta = 0.1 * jax.random.normal(kb, (E,), dtype=jnp.float32)
    running_mean = 0.1 * jax.random.normal(km, (E,), dtype=jnp.float32)
    running_var = jax.random.uniform(kv, (E,), dtype=jnp.float32,
                                     minval=0.5, maxval=1.5)

    out = cnn_block(x, weight, gamma, beta, running_mean, running_var,
                    stride=stride, padding=padding)
    out = jax.block_until_ready(out)

    ref = _reference(x, weight, gamma, beta, running_mean, running_var,
                     stride, padding, 1e-5)
    assert out.shape == (B, E, H, W), out.shape
    max_err = float(jnp.max(jnp.abs(out - ref)))
    assert jnp.allclose(out, ref, atol=2e-2, rtol=2e-2), max_err

    print("KERNEL_OK")
</pallas_src>

<mosaic_0001>
module attributes {stable_mosaic.version = 11 : i64} {
  func.func @_cnn_block_kernel(%arg0: i32, %arg1: memref<256x128xbf16, #tpu.memory_space<vmem>>, %arg2: memref<128x128xbf16, #tpu.memory_space<vmem>>, %arg3: memref<1x128xf32, #tpu.memory_space<vmem>>, %arg4: memref<1x128xf32, #tpu.memory_space<vmem>>, %arg5: memref<256x128xf32, #tpu.memory_space<vmem>>) attributes {dimension_semantics = [#tpu.dimension_semantics<parallel>], iteration_bounds = array<i64: 2>, scalar_prefetch = 0 : i64, scratch_operands = 0 : i64, tpu.core_type = #tpu.core_type<tc>, window_params = [{transform_indices = @transform_0, window_bounds = array<i64: 256, 128>}, {pipeline_mode = #tpu.pipeline_mode<synchronous>, transform_indices = @transform_1, window_bounds = array<i64: 128, 128>}, {pipeline_mode = #tpu.pipeline_mode<synchronous>, transform_indices = @transform_2, window_bounds = array<i64: 1, 128>}, {pipeline_mode = #tpu.pipeline_mode<synchronous>, transform_indices = @transform_3, window_bounds = array<i64: 1, 128>}, {transform_indices = @transform_4, window_bounds = array<i64: 256, 128>}]} {
    %c0 = arith.constant 0 : index
    %c0_0 = arith.constant 0 : index
    %0 = vector.load %arg1[%c0, %c0_0] : memref<256x128xbf16, #tpu.memory_space<vmem>>, vector<256x128xbf16>
    %c0_1 = arith.constant 0 : index
    %c0_2 = arith.constant 0 : index
    %1 = vector.load %arg2[%c0_1, %c0_2] : memref<128x128xbf16, #tpu.memory_space<vmem>>, vector<128x128xbf16>
    %cst = arith.constant dense<0.000000e+00> : vector<256x128xf32>
    %2 = tpu.matmul %0, %1, %cst {dimension_numbers = #tpu.dot_dimension_numbers<[1], [0], [0], [1], [0, 0, 1, 1], [], []>} : vector<256x128xbf16>, vector<128x128xbf16>, vector<256x128xf32> -> vector<256x128xf32>
    %c0_3 = arith.constant 0 : index
    %c0_4 = arith.constant 0 : index
    %3 = vector.load %arg3[%c0_3, %c0_4] : memref<1x128xf32, #tpu.memory_space<vmem>>, vector<1x128xf32>
    %4 = vector.broadcast %3 : vector<1x128xf32> to vector<256x128xf32>
    %5 = arith.mulf %2, %4 : vector<256x128xf32>
    %c0_5 = arith.constant 0 : index
    %c0_6 = arith.constant 0 : index
    %6 = vector.load %arg4[%c0_5, %c0_6] : memref<1x128xf32, #tpu.memory_space<vmem>>, vector<1x128xf32>
    %7 = vector.broadcast %6 : vector<1x128xf32> to vector<256x128xf32>
    %8 = arith.addf %5, %7 : vector<256x128xf32>
    %cst_7 = arith.constant 0.000000e+00 : f32
    %9 = vector.broadcast %cst_7 : f32 to vector<256x128xf32>
    %10 = arith.cmpf oge, %8, %9 : vector<256x128xf32>
    %cst_8 = arith.constant 1.000000e-01 : f32
    %11 = vector.broadcast %cst_8 : f32 to vector<256x128xf32>
    %12 = arith.mulf %11, %8 : vector<256x128xf32>
    %13 = arith.select %10, %8, %12 : vector<256x128xi1>, vector<256x128xf32>
    %c0_9 = arith.constant 0 : index
    %c0_10 = arith.constant 0 : index
    %14 = vector.load %arg5[%c0_9, %c0_10] : memref<256x128xf32, #tpu.memory_space<vmem>>, vector<256x128xf32>
    tpu.vector_store %arg5[%c0_9, %c0_10], %13 {strides = array<i32>} : memref<256x128xf32, #tpu.memory_space<vmem>>, vector<256x128xf32>,
    return
  }
  func.func @transform_0(%arg0: i32) -> (i32, i32) {
    %c0_i32 = arith.constant 0 : i32
    %c0_i32_0 = arith.constant 0 : i32
    return %arg0, %c0_i32 : i32, i32
  }
  func.func @transform_1(%arg0: i32) -> (i32, i32) {
    %c0_i32 = arith.constant 0 : i32
    %c0_i32_0 = arith.constant 0 : i32
    %c0_i32_1 = arith.constant 0 : i32
    return %c0_i32, %c0_i32_0 : i32, i32
  }
  func.func @transform_2(%arg0: i32) -> (i32, i32) {
    %c0_i32 = arith.constant 0 : i32
    %c0_i32_0 = arith.constant 0 : i32
    %c0_i32_1 = arith.constant 0 : i32
    return %c0_i32, %c0_i32_0 : i32, i32
  }
  func.func @transform_3(%arg0: i32) -> (i32, i32) {
    %c0_i32 = arith.constant 0 : i32
    %c0_i32_0 = arith.constant 0 : i32
    %c0_i32_1 = arith.constant 0 : i32
    return %c0_i32, %c0_i32_0 : i32, i32
  }
  func.func @transform_4(%arg0: i32) -> (i32, i32) {
    %c0_i32 = arith.constant 0 : i32
    %c0_i32_0 = arith.constant 0 : i32
    return %arg0, %c0_i32 : i32, i32
  }
}

</mosaic_0001>

<bundles_post_ra>
// kernel: tpu_custom_call.1
= control target key start
LH: loop header
LB: loop body
LE: loop exit
PB: predicated region body
PF: predicated region fallthrough
CT: control target
= control target key end

     0   :  { %9 = vsyncpa [#allocation3], 0  ;;  %s1606_s0 = inlined_call_operand.hbm [shape: bf16[512,128], index: 0, kind: input, shape index: {}]   ;;  %s1607_s1 = inlined_call_operand.hbm [shape: bf16[128,128], index: 1, kind: input, shape index: {}]   ;;  %s1608_s2 = inlined_call_operand.vmem [shape: f32[1,128], index: 2, kind: input, shape index: {}]   ;;  %s1609_s3 = inlined_call_operand.vmem [shape: f32[1,128], index: 3, kind: input, shape index: {}]   ;;  %s1610_s4 = inlined_call_operand.hbm [shape: f32[512,128], index: 4, kind: output, shape index: {}]  }
   0x1   :  { %11 = vsyncpa [#allocation3 + $0x1], 0 }
   0x2   :  { %12 = vsyncpa [#allocation6], 0 }
   0x3   :  { %13 = vsyncpa [#allocation4], 0 }
   0x4   :  { %15 = vsyncpa [#allocation4 + $0x1], 0  ;;  %s1269_s15 = smov 0   ;;  %s1271_s16 = smov 0  }
   0x5   :  { %s1273_s17 = smov 0   ;;  %s1275_s18 = smov 0  }
   0x6 LB: > { %s1290_s19 = sadd.s32 4294967295, %s1235_s18   ;;  %s890_s20 = sadd.s32 4294967294, %s1235_s18   ;;  %s1235_s18 = sphi %s1275_s18, %s1630_s18   ;;  %s1231_s17 = sphi %s1273_s17, %s1629_s17   ;;  %s1227_s16 = sphi %s1271_s16, %s1628_s16   ;;  %s1223_s15 = sphi %s1269_s15, %s1627_s15  }
   0x7   : > { %p41_p0 = scmp.ne.s32.totalorder %s1227_s16, %s1223_s15  ;;  %p1611_p1 = scmp.eq.s32.totalorder %s1290_s19, 0 }
   0x8   : > { %p134_p3 = scmp.eq.s32.totalorder %s890_s20, 1  ;;  %p891_p5 = scmp.ge.s32.totalorder %s1235_s18, 1 }
   0x9   : > { %p1299_p4 = por %p1611_p1, %p41_p0  ;;  %p141_p7 = scmp.lt.s32.totalorder %s1235_s18, 3 }
   0xa   : > { %p1304_p6 = por %p134_p3, %p41_p0  ;;  %s1237_s24 = smov [#allocation5]  }
   0xb   : > { %s1614_s21 = scalar_select %p1299_p4, 1, 0 }
   0xc   : > { %s1615_s22 = scalar_select %p1304_p6, 1, 0 }
   0xd   : > { %p1309_p8 = pnand %p891_p5, %p141_p7  ;;  %s153_s25 = sshll.u32 %s1237_s24, 4  ;;  %s1313_s25 = int_to_ptr.vmem [resolvable:$true] %s153_s25 }
   0xe   : > { %s1325_s27 = sadd.s32 1, %s1235_s18   ;;  %s28_s28 = sadd.s32 1, %s1231_s17 }
   0xf   : > { %s1616_s23 = scalar_select %p1309_p8, 1, 0 }
  0x10   : > { %p1030_p9 = pneg %p1309_p8  ;;  %s25_s29 = ssub.s32 %s1235_s18, %s1325_s27 }
  0x11   : > { %s1107_s6 = scalar_lea.hbm %s1607_s1, 1024 }
  0x12   : > { %p1320_p11 = pnand %p1030_p9, %p1611_p1  ;;  %p1108_p12 = scmp.ne.s32.totalorder %s1607_s1, %s1107_s6 }
  0x13   : > { %p1114_p5 = scmp.lt.u32.totalorder %s1107_s6, %s1607_s1 }
  0x14   : > { %p1109_p13 = pneg %p1320_p11 }
  0x16   : > { %p1110_p0 = pnand %p1109_p13, %p1108_p12 }
  0x18   : > { %p1111_p3 = pneg %p1110_p0 }
  0x1a   : > { %p1116_p7 = pnand %p1114_p5, %p1111_p3 }
  0x1c   : > { %1119 = shalt.err (!%p1116_p7)
}
  0x1d   : > { %s1120_s11 = scalar_lea.vmem %s1313_s25, 1024  ;;  %p1128_p2 = scmp.lt.s32.totalorder %s1313_s25, %s1313_s25 }
  0x1e   : > { %p1121_p9 = scmp.ne.s32.totalorder %s1313_s25, %s1120_s11  ;;  %p1129_p6 = scmp.lt.s32.totalorder %s1120_s11, %s1120_s11 }
  0x20   : > { %p1123_p10 = pnand %p1121_p9, %p1109_p13  ;;  %p1130_p4 = por %p1129_p6, %p1128_p2 }
  0x22   : > { %p1124_p1 = pneg %p1123_p10 }
  0x24   : > { %p1131_p8 = pnand %p1130_p4, %p1124_p1 }
  0x26   : > { %1134 = shalt.err (!%p1131_p8)
}
  0x27   : > { %s1238_s12 = smov 64   ;;  %s1239_s13 = smov 4  }
  0x28   : > { %1033 = dma.hbm_to_vmem [thread:$0]  (!%p1320_p11), %s1607_s1, 1024, %s1313_s25, [#allocation6], %s1238_s12, %s1238_s12, %s1239_s13  }
  0x29   : > { %p26_p1 = scmp.eq.s32.totalorder %s25_s29, 0  ;;  %p35_p2 = scmp.ne.s32.totalorder %s1231_s17, %s1227_s16 }
  0x2a   : > { %p36_p4 = scmp.eq.s32.totalorder %s1235_s18, 0  ;;  %p1043_p6 = scmp.lt.s32.totalorder %s1235_s18, 2 }
  0x2b   : > { %s1359_s24 = scalar_select %p26_p1, %s1231_s17, %s28_s28  }
  0x2c   : > { %p37_p8 = por %p36_p4, %p35_p2  ;;  %p1618_p10 = scmp.eq.s32.totalorder %s1290_s19, 1 }
  0x2d   : > { %s173_s26 = sand.u32 1, %s1231_s17   ;;  %s932_s5 = sshll.u32 %s1235_s18, 11 }
  0x2e   : > { %p1363_p12 = por %p1618_p10, %p35_p2  ;;  %s894_s6 = sshll.u32 %s173_s26, 7 }
  0x2f   : > { %s1372_s9 = scalar_lea.hbm %s1606_s0, %s932_s5  ;;  %s177_s25 = scalar_lea.vmem [#allocation2], %s894_s6 }
  0x30   : > { %s184_s28 = sshll.u32 %s177_s25, 4  ;;  %p1374_p11 = pnand %p1043_p6, %p37_p8  ;;  %s1378_s28 = int_to_ptr.vmem [resolvable:$true] %s184_s28 }
  0x31   : > { %s1380_s10 = scalar_lea.sflag [#allocation3], %s173_s26  ;;  %s1135_s11 = scalar_lea.hbm %s1372_s9, 2048 }
  0x32   : > { %p1136_p13 = scmp.ne.s32.totalorder %s1372_s9, %s1135_s11  ;;  %p1137_p0 = pneg %p1374_p11 }
  0x33   : > { %s1140_s5 = scalar_lea.hbm %s1606_s0, 4096  ;;  %p1141_p7 = scmp.lt.u32.totalorder %s1372_s9, %s1606_s0 }
  0x34   : > { %p1138_p3 = pnand %p1137_p0, %p1136_p13  ;;  %p1142_p9 = scmp.lt.u32.totalorder %s1140_s5, %s1135_s11 }
  0x35   : > { %p1144_p2 = scmp.lt.u32.totalorder %s1135_s11, %s1372_s9 }
  0x36   : > { %p1139_p5 = pneg %p1138_p3  ;;  %p1143_p1 = por %p1142_p9, %p1141_p7 }
  0x38   : > { %p1145_p4 = por %p1144_p2, %p1143_p1 }
  0x3a   : > { %p1146_p6 = pnand %p1145_p4, %p1139_p5 }
  0x3c   : > { %1149 = shalt.err (!%p1146_p6)
}
  0x3d   : > { %s1150_s26 = scalar_lea.vmem %s1378_s28, 2048  ;;  %s1240_s8 = smov [#allocation2]  }
  0x3e   : > { %p1151_p8 = scmp.ne.s32.totalorder %s1378_s28, %s1150_s26  ;;  %s1155_s25 = sshll.u32 %s1240_s8, 4  ;;  %s1156_s25 = int_to_ptr.vmem [resolvable:$false] %s1155_s25 }
  0x3f   : > { %s1157_s14 = scalar_lea.vmem %s1156_s25, 4096  ;;  %p1158_p3 = scmp.lt.s32.totalorder %s1378_s28, %s1156_s25 }
  0x40   : > { %p1153_p10 = pnand %p1151_p8, %p1137_p0  ;;  %p1159_p7 = scmp.lt.s32.totalorder %s1157_s14, %s1150_s26 }
  0x42   : > { %p1154_p13 = pneg %p1153_p10  ;;  %p1160_p9 = por %p1159_p7, %p1158_p3 }
  0x44   : > { %p1161_p1 = pnand %p1160_p9, %p1154_p13 }
  0x46   : > { %1164 = shalt.err (!%p1161_p1)
}
  0x47   : > { %1037 = dma.hbm_to_vmem [thread:$0]  (!%p1374_p11), %s1372_s9, 2048, %s1378_s28, %s1380_s10, %s1238_s12, %s1238_s12, %s1239_s13  }
  0x48   : > { %p1621_p0 = scmp.ne.s32.totalorder %s1616_s23, 0 }
  0x49   : > { %s1414_s11 = sand.u32 (!%p1621_p0), 1, %s1227_s16   ;;  %p1622_p5 = scmp.ne.s32.totalorder (!%p1621_p0), %s1614_s21, 0 }
  0x4a   : > { %196 = sbr.rel (%p1621_p0) target bundleno = 389 (0x185), region = 36  ;;  %s898_s20 = sshll.u32 (!%p1621_p0), %s1414_s11, 7 }
  0x4b   : > { %s199_s5 = scalar_lea.sflag (!%p1621_p0), [#allocation3], %s1414_s11  ;;  %s1418_s6 = scalar_lea.vmem (!%p1621_p0), [#allocation2], %s898_s20 }
  0x51   : > { %1210 = dma.done.wait (%p1622_p5), %s199_s5, 2048  }
  0x52   : > { %1212 = vsyncadd (%p1622_p5), %s199_s5, 4294965248  ;;  %p1623_p11 = scmp.eq.s32.totalorder %s1290_s19, 0 }
  0x54   : > { %1214 = dma.done.wait (%p1623_p11), [#allocation6], 1024   ;;  %p1624_p2 = pmov %p1623_p11 }
  0x55   : > { %v1083_v0 = vld [vmem:[#allocation5] sm:$0xff]   ;;  %v1084_v1 = vld [vmem:[#allocation5 + $0x8] sm:$0xff]   ;;  %v1085_v2 = vld [vmem:[#allocation5 + $0x10] sm:$0xff]   ;;  %s900_s9 = sshll.u32 %s1414_s11, 8  ;;  %s933_s29 = sshll.u32 %s1290_s19, 12 }
  0x56   : > { %1216 = vsyncadd (%p1624_p2), [#allocation6], 4294966272  ;;  %958 = vmatprep.subr.bf16.mxu0 %v1083_v0  ;;  %1006 = vmatprep.subr.bf16.mxu1 %v1083_v0  ;;  %v1086_v3 = vld [vmem:[#allocation5 + $0x18] sm:$0xff]   ;;  %v1091_v4 = vld [vmem:[%s1418_s6] sm:$0xff]   ;;  %s1471_s28 = scalar_lea.vmem [#allocation7], %s900_s9  ;;  %s1556_s26 = scalar_lea.hbm %s1610_s4, %s933_s29 }
  0x57   : > { %959 = vmatpush3.bf16.msra.mxu0 %v1083_v0  ;;  %1014 = vmatpush3.bf16.msra.mxu1 %v1083_v0  ;;  %v1092_v5 = vld [vmem:[%s1418_s6 + $0x40] sm:$0xff]   ;;  %v1088_v7 = vld [vmem:[#allocation5 + $0x28] sm:$0xff]   ;;  %v1089_v8 = vld [vmem:[#allocation5 + $0x30] sm:$0xff]   ;;  %s807_s10 = sshll.u32 %s1471_s28, 4  ;;  %s794_s8 = scalar_lea.sflag [#allocation4], %s1414_s11  ;;  %s1558_s10 = int_to_ptr.vmem [resolvable:$true] %s807_s10 }
  0x58   : > { %960 = vmatprep.subr.bf16.mxu0 %v1084_v1  ;;  %1007 = vmatprep.subr.bf16.mxu1 %v1084_v1  ;;  %v1087_v6 = vld [vmem:[#allocation5 + $0x20] sm:$0xff]   ;;  %v1090_v9 = vld [vmem:[#allocation5 + $0x38] sm:$0xff]   ;;  %v1093_v10 = vld [vmem:[%s1418_s6 + $0x8] sm:$0xff]   ;;  %s1165_s25 = scalar_lea.vmem %s1558_s10, 4096  ;;  %s1241_s14 = smov [#allocation7]  }
  0x59   : > { %974 = vmatprep.mubr.bf16.mxu0 %v1091_v4  ;;  %990 = vmatprep.mubr.bf16.mxu1 %v1092_v5  ;;  %v1094_v11 = vld [vmem:[%s1418_s6 + $0x48] sm:$0xff]   ;;  %v1095_v12 = vld [vmem:[%s1418_s6 + $0x10] sm:$0xff]   ;;  %v1097_v14 = vld [vmem:[%s1418_s6 + $0x18] sm:$0xff]   ;;  %p1166_p4 = scmp.ne.s32.totalorder %s1558_s10, %s1165_s25  ;;  %s1169_s20 = sshll.u32 %s1241_s14, 4  ;;  %s1170_s20 = int_to_ptr.vmem [resolvable:$false] %s1169_s20 }
  0x5a   : > { %v1096_v13 = vld [vmem:[%s1418_s6 + $0x50] sm:$0xff]   ;;  %v1098_v15 = vld [vmem:[%s1418_s6 + $0x58] sm:$0xff]   ;;  %v1099_v16 = vld [vmem:[%s1418_s6 + $0x20] sm:$0xff]   ;;  %s1171_s5 = scalar_lea.vmem %s1170_s20, 8192  ;;  %p1172_p10 = scmp.lt.s32.totalorder %s1558_s10, %s1170_s20 }
  0x5b   : > { %961 = vmatpush3.bf16.msra.mxu0 %v1084_v1  ;;  %1015 = vmatpush3.bf16.msra.mxu1 %v1084_v1  ;;  %v1100_v17 = vld [vmem:[%s1418_s6 + $0x60] sm:$0xff]   ;;  %v1101_v18 = vld [vmem:[%s1418_s6 + $0x28] sm:$0xff]   ;;  %v1103_v20 = vld [vmem:[%s1418_s6 + $0x30] sm:$0xff]   ;;  %p1167_p6 = pnand %p1166_p4, %p1363_p12  ;;  %p1173_p13 = scmp.lt.s32.totalorder %s1171_s5, %s1165_s25 }
  0x5c   : > { %962 = vmatprep.subr.bf16.mxu0 %v1085_v2  ;;  %1008 = vmatprep.subr.bf16.mxu1 %v1085_v2  ;;  %v1102_v19 = vld [vmem:[%s1418_s6 + $0x68] sm:$0xff]   ;;  %v1104_v21 = vld [vmem:[%s1418_s6 + $0x70] sm:$0xff]   ;;  %v1105_v22 = vld [vmem:[%s1418_s6 + $0x38] sm:$0xff]  }
  0x5d   : > { %v1106_v23 = vld [vmem:[%s1418_s6 + $0x78] sm:$0xff]   ;;  %v1447_v24 = vld [vmem:[%s1608_s2] ss:$0 sm:$0xff]  ;;  %p1168_p8 = pneg %p1167_p6  ;;  %p1174_p3 = por %p1173_p13, %p1172_p10 }
  0x5e   : > { %v1452_v26 = vld [vmem:[%s1609_s3] ss:$0 sm:$0xff] }
  0x5f   : > { %963 = vmatpush3.bf16.msra.mxu0 %v1085_v2  ;;  %1016 = vmatpush3.bf16.msra.mxu1 %v1085_v2  ;;  %p1175_p7 = pnand %p1174_p3, %p1168_p8 }
  0x60   : > { %964 = vmatprep.subr.bf16.mxu0 %v1086_v3  ;;  %1009 = vmatprep.subr.bf16.mxu1 %v1086_v3 }
  0x63   : > { %965 = vmatpush3.bf16.msra.mxu0 %v1086_v3  ;;  %1017 = vmatpush3.bf16.msra.mxu1 %v1086_v3 }
  0x64   : > { %966 = vmatprep.subr.bf16.mxu0 %v1087_v6  ;;  %1010 = vmatprep.subr.bf16.mxu1 %v1087_v6 }
  0x67   : > { %967 = vmatpush3.bf16.msra.mxu0 %v1087_v6  ;;  %1018 = vmatpush3.bf16.msra.mxu1 %v1087_v6 }
  0x68   : > { %968 = vmatprep.subr.bf16.mxu0 %v1088_v7  ;;  %1011 = vmatprep.subr.bf16.mxu1 %v1088_v7 }
  0x6b   : > { %969 = vmatpush3.bf16.msra.mxu0 %v1088_v7  ;;  %1019 = vmatpush3.bf16.msra.mxu1 %v1088_v7 }
  0x6c   : > { %970 = vmatprep.subr.bf16.mxu0 %v1089_v8  ;;  %1012 = vmatprep.subr.bf16.mxu1 %v1089_v8 }
  0x6f   : > { %971 = vmatpush3.bf16.msra.mxu0 %v1089_v8  ;;  %1020 = vmatpush3.bf16.msra.mxu1 %v1089_v8 }
  0x70   : > { %972 = vmatprep.subr.bf16.mxu0 %v1090_v9  ;;  %1013 = vmatprep.subr.bf16.mxu1 %v1090_v9 }
  0x73   : > { %973 = vmatpush3.bf16.msra.mxu0 %v1090_v9  ;;  %1021 = vmatpush3.bf16.msra.mxu1 %v1090_v9 }
  0x76   : > { %975 = vmatmul.mubr.bf16.vlgmr.msra.gmra.mrb[0].mxu0 %v1093_v10  ;;  %991 = vmatmul.mubr.bf16.vlgmr.msra.gmra.mrb[0].mxu1 %v1094_v11 }
  0x77   : > { %978 = vmatprep.mubr.bf16.mxu0 %v1095_v12  ;;  %994 = vmatprep.mubr.bf16.mxu1 %v1096_v13 }
  0x7e   : > { %979 = vmatmul.mubr.bf16.gmra.mrb[4].mxu0 %v1097_v14  ;;  %995 = vmatmul.mubr.bf16.gmra.mrb[4].mxu1 %v1098_v15 }
  0x7f   : > { %982 = vmatprep.mubr.bf16.mxu0 %v1099_v16  ;;  %998 = vmatprep.mubr.bf16.mxu1 %v1100_v17 }
  0x86   : > { %983 = vmatmul.mubr.bf16.gmra.mrb[8].mxu0 %v1101_v18  ;;  %999 = vmatmul.mubr.bf16.gmra.mrb[8].mxu1 %v1102_v19 }
  0x87   : > { %986 = vmatprep.mubr.bf16.mxu0 %v1103_v20  ;;  %1002 = vmatprep.mubr.bf16.mxu1 %v1104_v21 }
  0x8e   : > { %987 = vmatmul.mubr.bf16.gmra.mrb[12].mxu0 %v1105_v22  ;;  %1003 = vmatmul.mubr.bf16.gmra.mrb[12].mxu1 %v1106_v23 }
 0x149   : > { %v976_v25 = vpop.f32.mrb[0].mxu0  ;;  %v992_v27 = vpop.f32.mrb[0].mxu1 }
 0x14a   : > { %v596_v28 = vmul.f32 %v976_v25, %v1447_v24  ;;  %v612_v29 = vmul.f32 %v992_v27, %v1447_v24  ;;  %v460_v30 = vpop.f32.mrb[1].mxu0  ;;  %v524_v31 = vpop.f32.mrb[1].mxu1 }
 0x14b   : > { %v594_v32 = vmul.f32 %v1447_v24, %v460_v30  ;;  %v610_v33 = vmul.f32 %v1447_v24, %v524_v31  ;;  %v977_v34 = vpop.f32.mrb[2].mxu0  ;;  %v993_v35 = vpop.f32.mrb[2].mxu1 }
 0x14c   : > { %v635_v36 = vadd.f32 %v1452_v26, %v596_v28  ;;  %v651_v37 = vadd.f32 %v1452_v26, %v612_v29  ;;  %v597_v38 = vmul.f32 %v977_v34, %v1447_v24  ;;  %v613_v39 = vmul.f32 %v993_v35, %v1447_v24  ;;  %v463_v40 = vpop.f32.mrb[3].mxu0  ;;  %v527_v41 = vpop.f32.mrb[3].mxu1 }
 0x14d   : > { %v633_v42 = vadd.f32 %v1452_v26, %v594_v32  ;;  %v649_v43 = vadd.f32 %v1452_v26, %v610_v33  ;;  %v595_v44 = vmul.f32 %v1447_v24, %v463_v40  ;;  %v611_v45 = vmul.f32 %v1447_v24, %v527_v41 }
 0x14e   : > { %vm667_vm0 = vcmp.ge.f32.partialorder %v635_v36, 0.0  ;;  %v699_v46 = vmul.f32 0.1, %v635_v36  ;;  %vm683_vm1 = vcmp.ge.f32.partialorder %v651_v37, 0.0  ;;  %v715_v47 = vmul.f32 0.1, %v651_v37 }
 0x14f   : > { %vm665_vm2 = vcmp.ge.f32.partialorder %v633_v42, 0.0  ;;  %v697_v48 = vmul.f32 0.1, %v633_v42  ;;  %vm681_vm3 = vcmp.ge.f32.partialorder %v649_v43, 0.0  ;;  %v713_v49 = vmul.f32 0.1, %v649_v43 }
 0x150   : > { %v731_v50 = vsel %vm667_vm0, %v635_v36, %v699_v46  ;;  %v747_v51 = vsel %vm683_vm1, %v651_v37, %v715_v47  ;;  %v636_v52 = vadd.f32 %v1452_v26, %v597_v38  ;;  %v652_v53 = vadd.f32 %v1452_v26, %v613_v39 }
 0x151   : > { %763 = vst [vmem:[%s1471_s28 + $0x10] sm:$0xff] %v731_v50  ;;  %779 = vst [vmem:[%s1471_s28 + $0x90] sm:$0xff] %v747_v51  ;;  %v729_v54 = vsel %vm665_vm2, %v633_v42, %v697_v48  ;;  %v745_v55 = vsel %vm681_vm3, %v649_v43, %v713_v49  ;;  %v634_v56 = vadd.f32 %v1452_v26, %v595_v44  ;;  %v980_v58 = vpop.f32.mrb[4].mxu0  ;;  %v996_v59 = vpop.f32.mrb[4].mxu1 }
 0x152   : > { %v650_v57 = vadd.f32 %v1452_v26, %v611_v45  ;;  %761 = vst [vmem:[%s1471_s28] sm:$0xff] %v729_v54  ;;  %777 = vst [vmem:[%s1471_s28 + $0x80] sm:$0xff] %v745_v55  ;;  %vm668_vm4 = vcmp.ge.f32.partialorder %v636_v52, 0.0  ;;  %v700_v60 = vmul.f32 0.1, %v636_v52  ;;  %vm684_vm5 = vcmp.ge.f32.partialorder %v652_v53, 0.0  ;;  %v476_v4 = vpop.f32.mrb[5].mxu0 }
 0x153   : > { %v716_v61 = vmul.f32 0.1, %v652_v53  ;;  %vm666_vm6 = vcmp.ge.f32.partialorder %v634_v56, 0.0  ;;  %v698_v62 = vmul.f32 0.1, %v634_v56  ;;  %v600_v2 = vmul.f32 %v980_v58, %v1447_v24  ;;  %v540_v5 = vpop.f32.mrb[5].mxu1 }
 0x154   : > { %vm682_vm7 = vcmp.ge.f32.partialorder %v650_v57, 0.0  ;;  %v714_v63 = vmul.f32 0.1, %v650_v57  ;;  %v732_v0 = vsel %vm668_vm4, %v636_v52, %v700_v60  ;;  %v616_v3 = vmul.f32 %v996_v59, %v1447_v24  ;;  %v981_v10 = vpop.f32.mrb[6].mxu0  ;;  %v997_v11 = vpop.f32.mrb[6].mxu1 }
 0x155   : > { %v748_v1 = vsel %vm684_vm5, %v652_v53, %v716_v61  ;;  %764 = vst [vmem:[%s1471_s28 + $0x18] sm:$0xff] %v732_v0  ;;  %v730_v6 = vsel %vm666_vm6, %v634_v56, %v698_v62  ;;  %v598_v8 = vmul.f32 %v1447_v24, %v476_v4  ;;  %v614_v9 = vmul.f32 %v1447_v24, %v540_v5  ;;  %v479_v16 = vpop.f32.mrb[7].mxu0  ;;  %v543_v17 = vpop.f32.mrb[7].mxu1 }
 0x156   : > { %780 = vst [vmem:[%s1471_s28 + $0x98] sm:$0xff] %v748_v1  ;;  %v746_v7 = vsel %vm682_vm7, %v650_v57, %v714_v63  ;;  %762 = vst [vmem:[%s1471_s28 + $0x8] sm:$0xff] %v730_v6  ;;  %v639_v12 = vadd.f32 %v1452_v26, %v600_v2  ;;  %v655_v13 = vadd.f32 %v1452_v26, %v616_v3 }
 0x157   : > { %778 = vst [vmem:[%s1471_s28 + $0x88] sm:$0xff] %v746_v7  ;;  %v601_v14 = vmul.f32 %v981_v10, %v1447_v24  ;;  %v617_v15 = vmul.f32 %v997_v11, %v1447_v24  ;;  %v637_v18 = vadd.f32 %v1452_v26, %v598_v8  ;;  %v653_v19 = vadd.f32 %v1452_v26, %v614_v9 }
 0x158   : > { %v599_v20 = vmul.f32 %v1447_v24, %v479_v16  ;;  %v615_v21 = vmul.f32 %v1447_v24, %v543_v17  ;;  %vm671_vm8 = vcmp.ge.f32.partialorder %v639_v12, 0.0  ;;  %v703_v22 = vmul.f32 0.1, %v639_v12 }
 0x159   : > { %vm687_vm9 = vcmp.ge.f32.partialorder %v655_v13, 0.0  ;;  %v719_v23 = vmul.f32 0.1, %v655_v13  ;;  %vm669_vm10 = vcmp.ge.f32.partialorder %v637_v18, 0.0  ;;  %v701_v25 = vmul.f32 0.1, %v637_v18 }
 0x15a   : > { %vm685_vm11 = vcmp.ge.f32.partialorder %v653_v19, 0.0  ;;  %v717_v27 = vmul.f32 0.1, %v653_v19  ;;  %v735_v28 = vsel %vm671_vm8, %v639_v12, %v703_v22  ;;  %v640_v30 = vadd.f32 %v1452_v26, %v601_v14  ;;  %v984_v32 = vpop.f32.mrb[8].mxu0  ;;  %v1000_v33 = vpop.f32.mrb[8].mxu1 }
 0x15b   : > { %v751_v29 = vsel %vm687_vm9, %v655_v13, %v719_v23  ;;  %v656_v31 = vadd.f32 %v1452_v26, %v617_v15  ;;  %767 = vst [vmem:[%s1471_s28 + $0x30] sm:$0xff] %v735_v28  ;;  %v733_v34 = vsel %vm669_vm10, %v637_v18, %v701_v25  ;;  %v638_v36 = vadd.f32 %v1452_v26, %v599_v20  ;;  %v492_v38 = vpop.f32.mrb[9].mxu0  ;;  %v556_v39 = vpop.f32.mrb[9].mxu1 }
 0x15c   : > { %783 = vst [vmem:[%s1471_s28 + $0xb0] sm:$0xff] %v751_v29  ;;  %v749_v35 = vsel %vm685_vm11, %v653_v19, %v717_v27  ;;  %v654_v37 = vadd.f32 %v1452_v26, %v615_v21  ;;  %765 = vst [vmem:[%s1471_s28 + $0x20] sm:$0xff] %v733_v34  ;;  %vm672_vm12 = vcmp.ge.f32.partialorder %v640_v30, 0.0  ;;  %v704_v40 = vmul.f32 0.1, %v640_v30  ;;  %v985_v48 = vpop.f32.mrb[10].mxu0 }
 0x15d   : > { %781 = vst [vmem:[%s1471_s28 + $0xa0] sm:$0xff] %v749_v35  ;;  %vm688_vm13 = vcmp.ge.f32.partialorder %v656_v31, 0.0  ;;  %v720_v41 = vmul.f32 0.1, %v656_v31  ;;  %vm670_vm14 = vcmp.ge.f32.partialorder %v638_v36, 0.0  ;;  %v604_v46 = vmul.f32 %v984_v32, %v1447_v24  ;;  %v1001_v49 = vpop.f32.mrb[10].mxu1 }
 0x15e   : > { %v702_v42 = vmul.f32 0.1, %v638_v36  ;;  %vm686_vm15 = vcmp.ge.f32.partialorder %v654_v37, 0.0  ;;  %v718_v43 = vmul.f32 0.1, %v654_v37  ;;  %v736_v44 = vsel %vm672_vm12, %v640_v30, %v704_v40  ;;  %v495_v54 = vpop.f32.mrb[11].mxu0 }
 0x15f   : > { %v752_v45 = vsel %vm688_vm13, %v656_v31, %v720_v41  ;;  %v620_v47 = vmul.f32 %v1000_v33, %v1447_v24  ;;  %768 = vst [vmem:[%s1471_s28 + $0x38] sm:$0xff] %v736_v44  ;;  %v602_v52 = vmul.f32 %v1447_v24, %v492_v38  ;;  %v618_v53 = vmul.f32 %v1447_v24, %v556_v39  ;;  %v559_v55 = vpop.f32.mrb[11].mxu1 }
 0x160   : > { %784 = vst [vmem:[%s1471_s28 + $0xb8] sm:$0xff] %v752_v45  ;;  %v734_v50 = vsel %vm670_vm14, %v638_v36, %v702_v42  ;;  %v750_v51 = vsel %vm686_vm15, %v654_v37, %v718_v43  ;;  %v643_v56 = vadd.f32 %v1452_v26, %v604_v46  ;;  %v605_v58 = vmul.f32 %v985_v48, %v1447_v24 }
 0x161   : > { %766 = vst [vmem:[%s1471_s28 + $0x28] sm:$0xff] %v734_v50  ;;  %782 = vst [vmem:[%s1471_s28 + $0xa8] sm:$0xff] %v750_v51  ;;  %v659_v57 = vadd.f32 %v1452_v26, %v620_v47  ;;  %v621_v59 = vmul.f32 %v1001_v49, %v1447_v24  ;;  %v641_v60 = vadd.f32 %v1452_v26, %v602_v52  ;;  %v988_v0 = vpop.f32.mrb[12].mxu0  ;;  %v1004_v1 = vpop.f32.mrb[12].mxu1 }
 0x162   : > { %v657_v61 = vadd.f32 %v1452_v26, %v618_v53  ;;  %v603_v62 = vmul.f32 %v1447_v24, %v495_v54  ;;  %v619_v63 = vmul.f32 %v1447_v24, %v559_v55  ;;  %vm675_vm0 = vcmp.ge.f32.partialorder %v643_v56, 0.0  ;;  %v508_v10 = vpop.f32.mrb[13].mxu0  ;;  %v572_v11 = vpop.f32.mrb[13].mxu1 }
 0x163   : > { %v707_v2 = vmul.f32 0.1, %v643_v56  ;;  %vm691_vm1 = vcmp.ge.f32.partialorder %v659_v57, 0.0  ;;  %v723_v3 = vmul.f32 0.1, %v659_v57  ;;  %vm673_vm2 = vcmp.ge.f32.partialorder %v641_v60, 0.0 }
 0x164   : > { %v705_v4 = vmul.f32 0.1, %v641_v60  ;;  %vm689_vm3 = vcmp.ge.f32.partialorder %v657_v61, 0.0  ;;  %v721_v5 = vmul.f32 0.1, %v657_v61  ;;  %v644_v8 = vadd.f32 %v1452_v26, %v605_v58  ;;  %v989_v16 = vpop.f32.mrb[14].mxu0 }
 0x165   : > { %v739_v6 = vsel %vm675_vm0, %v643_v56, %v707_v2  ;;  %v755_v7 = vsel %vm691_vm1, %v659_v57, %v723_v3  ;;  %v660_v9 = vadd.f32 %v1452_v26, %v621_v59  ;;  %v642_v14 = vadd.f32 %v1452_v26, %v603_v62  ;;  %v1005_v17 = vpop.f32.mrb[14].mxu1  ;;  %v511_v28 = vpop.f32.mrb[15].mxu0 }
 0x166   : > { %771 = vst [vmem:[%s1471_s28 + $0x50] sm:$0xff] %v739_v6  ;;  %787 = vst [vmem:[%s1471_s28 + $0xd0] sm:$0xff] %v755_v7  ;;  %v737_v12 = vsel %vm673_vm2, %v641_v60, %v705_v4  ;;  %v753_v13 = vsel %vm689_vm3, %v657_v61, %v721_v5  ;;  %v658_v15 = vadd.f32 %v1452_v26, %v619_v63  ;;  %vm676_vm4 = vcmp.ge.f32.partialorder %v644_v8, 0.0  ;;  %v575_v29 = vpop.f32.mrb[15].mxu1 }
 0x167   : > { %769 = vst [vmem:[%s1471_s28 + $0x40] sm:$0xff] %v737_v12  ;;  %785 = vst [vmem:[%s1471_s28 + $0xc0] sm:$0xff] %v753_v13  ;;  %v708_v18 = vmul.f32 0.1, %v644_v8  ;;  %vm692_vm5 = vcmp.ge.f32.partialorder %v660_v9, 0.0  ;;  %vm674_vm6 = vcmp.ge.f32.partialorder %v642_v14, 0.0  ;;  %v608_v25 = vmul.f32 %v988_v0, %v1447_v24 }
 0x168   : > { %v724_v19 = vmul.f32 0.1, %v660_v9  ;;  %v706_v20 = vmul.f32 0.1, %v642_v14  ;;  %vm690_vm7 = vcmp.ge.f32.partialorder %v658_v15, 0.0  ;;  %v624_v27 = vmul.f32 %v1004_v1, %v1447_v24 }
 0x169   : > { %v722_v21 = vmul.f32 0.1, %v658_v15  ;;  %v740_v22 = vsel %vm676_vm4, %v644_v8, %v708_v18  ;;  %v606_v32 = vmul.f32 %v1447_v24, %v508_v10  ;;  %v622_v33 = vmul.f32 %v1447_v24, %v572_v11 }
 0x16a   : > { %v756_v23 = vsel %vm692_vm5, %v660_v9, %v724_v19  ;;  %772 = vst [vmem:[%s1471_s28 + $0x58] sm:$0xff] %v740_v22  ;;  %v738_v30 = vsel %vm674_vm6, %v642_v14, %v706_v20  ;;  %v647_v34 = vadd.f32 %v1452_v26, %v608_v25  ;;  %v663_v35 = vadd.f32 %v1452_v26, %v624_v27 }
 0x16b   : > { %788 = vst [vmem:[%s1471_s28 + $0xd8] sm:$0xff] %v756_v23  ;;  %v754_v31 = vsel %vm690_vm7, %v658_v15, %v722_v21  ;;  %770 = vst [vmem:[%s1471_s28 + $0x48] sm:$0xff] %v738_v30  ;;  %v609_v36 = vmul.f32 %v989_v16, %v1447_v24  ;;  %v625_v37 = vmul.f32 %v1005_v17, %v1447_v24 }
 0x16c   : > { %786 = vst [vmem:[%s1471_s28 + $0xc8] sm:$0xff] %v754_v31  ;;  %v645_v38 = vadd.f32 %v1452_v26, %v606_v32  ;;  %v661_v39 = vadd.f32 %v1452_v26, %v622_v33  ;;  %v607_v40 = vmul.f32 %v1447_v24, %v511_v28  ;;  %v623_v41 = vmul.f32 %v1447_v24, %v575_v29 }
 0x16d   : > { %vm679_vm8 = vcmp.ge.f32.partialorder %v647_v34, 0.0  ;;  %v711_v42 = vmul.f32 0.1, %v647_v34  ;;  %vm695_vm9 = vcmp.ge.f32.partialorder %v663_v35, 0.0  ;;  %v727_v43 = vmul.f32 0.1, %v663_v35 }
 0x16e   : > { %vm677_vm10 = vcmp.ge.f32.partialorder %v645_v38, 0.0  ;;  %v709_v44 = vmul.f32 0.1, %v645_v38  ;;  %vm693_vm11 = vcmp.ge.f32.partialorder %v661_v39, 0.0  ;;  %v725_v45 = vmul.f32 0.1, %v661_v39 }
 0x16f   : > { %v743_v46 = vsel %vm679_vm8, %v647_v34, %v711_v42  ;;  %v759_v47 = vsel %vm695_vm9, %v663_v35, %v727_v43  ;;  %v648_v48 = vadd.f32 %v1452_v26, %v609_v36  ;;  %v664_v49 = vadd.f32 %v1452_v26, %v625_v37 }
 0x170   : > { %775 = vst [vmem:[%s1471_s28 + $0x70] sm:$0xff] %v743_v46  ;;  %791 = vst [vmem:[%s1471_s28 + $0xf0] sm:$0xff] %v759_v47  ;;  %v741_v24 = vsel %vm677_vm10, %v645_v38, %v709_v44  ;;  %v757_v50 = vsel %vm693_vm11, %v661_v39, %v725_v45  ;;  %v646_v51 = vadd.f32 %v1452_v26, %v607_v40 }
 0x171   : > { %v662_v52 = vadd.f32 %v1452_v26, %v623_v41  ;;  %773 = vst [vmem:[%s1471_s28 + $0x60] sm:$0xff] %v741_v24  ;;  %789 = vst [vmem:[%s1471_s28 + $0xe0] sm:$0xff] %v757_v50  ;;  %vm680_vm12 = vcmp.ge.f32.partialorder %v648_v48, 0.0  ;;  %v712_v53 = vmul.f32 0.1, %v648_v48  ;;  %vm696_vm13 = vcmp.ge.f32.partialorder %v664_v49, 0.0 }
 0x172   : > { %v728_v54 = vmul.f32 0.1, %v664_v49  ;;  %vm678_vm14 = vcmp.ge.f32.partialorder %v646_v51, 0.0  ;;  %v710_v55 = vmul.f32 0.1, %v646_v51 }
 0x173   : > { %vm694_vm15 = vcmp.ge.f32.partialorder %v662_v52, 0.0  ;;  %v726_v56 = vmul.f32 0.1, %v662_v52  ;;  %v744_v26 = vsel %vm680_vm12, %v648_v48, %v712_v53 }
 0x174   : > { %v760_v57 = vsel %vm696_vm13, %v664_v49, %v728_v54  ;;  %776 = vst [vmem:[%s1471_s28 + $0x78] sm:$0xff] %v744_v26  ;;  %v742_v58 = vsel %vm678_vm14, %v646_v51, %v710_v55 }
 0x175   : > { %792 = vst [vmem:[%s1471_s28 + $0xf8] sm:$0xff] %v760_v57  ;;  %v758_v59 = vsel %vm694_vm15, %v662_v52, %v726_v56  ;;  %774 = vst [vmem:[%s1471_s28 + $0x68] sm:$0xff] %v742_v58 }
 0x176   : > { %790 = vst [vmem:[%s1471_s28 + $0xe8] sm:$0xff] %v758_v59 }
 0x177   : > { %1178 = shalt.err (!%p1175_p7)
}
 0x178   : > { %s1179_s6 = scalar_lea.hbm %s1556_s26, 4096  ;;  %s1183_s12 = scalar_lea.hbm %s1610_s4, 8192 }
 0x179   : > { %p1180_p9 = scmp.ne.s32.totalorder %s1556_s26, %s1179_s6  ;;  %p1184_p5 = scmp.lt.u32.totalorder %s1556_s26, %s1610_s4 }
 0x17a   : > { %p1185_p11 = scmp.lt.u32.totalorder %s1183_s12, %s1179_s6  ;;  %p1187_p4 = scmp.lt.u32.totalorder %s1179_s6, %s1556_s26 }
 0x17b   : > { %p1181_p1 = pnand %p1180_p9, %p1363_p12 }
 0x17c   : > { %p1186_p2 = por %p1185_p11, %p1184_p5 }
 0x17d   : > { %p1182_p0 = pneg %p1181_p1 }
 0x17e   : > { %p1188_p6 = por %p1187_p4, %p1186_p2 }
 0x180   : > { %p1189_p8 = pnand %p1188_p6, %p1182_p0 }
 0x182   : > { %1192 = shalt.err (!%p1189_p8)
}
 0x183   : > { %s1242_s28 = smov 128   ;;  %s1243_s29 = smov 8  }
 0x184   : > { %1028 = dma.vmem_to_hbm [thread:$0]  (%p1363_p12), %s1558_s10, 4096, %s1556_s26, %s794_s8, %s1242_s28, %s1242_s28, %s1243_s29  }
 0x185 PF: > { %s822_s19 = sand.u32 1, %s1223_s15   ;;  %p1625_p10 = scmp.ne.s32.totalorder %s1615_s22, 0 }
 0x186   : > { %p1626_p13 = scmp.ge.s32.totalorder %s1235_s18, 2  ;;  %s823_s7 = scalar_lea.sflag [#allocation4], %s822_s19 }
 0x188   : > { %p1039_p3 = pnand %p1626_p13, %p1625_p10 }
 0x18a   : > { %1218 = dma.done.wait (!%p1039_p3), %s823_s7, 4096  }
 0x18b   : > { %1220 = vsyncadd (!%p1039_p3), %s823_s7, 4294963200  ;;  %p18_p7 = scmp.ge.s32.totalorder %s1325_s27, 4   ;;  %s1627_s15 = smov %s1227_s16 }
 0x18c   : > { %s1628_s16 = smov %s1231_s17  ;;  %s1629_s17 = smov %s1359_s24 }
 0x18d   : > { %s1630_s18 = smov %s1325_s27  ;;  %20 = sbr.rel (!%p18_p7) target bundleno = 6 (0x6), region = 85 }
 0x194   :  { %828 = vsyncpa [#allocation3], 1 }
 0x195   :  { %830 = vsyncpa [#allocation3 + $0x1], 1 }
 0x196   :  { %831 = vsyncpa [#allocation6], 1 }
 0x197   :  { %832 = vsyncpa [#allocation4], 1 }
 0x198   :  { %834 = vsyncpa [#allocation4 + $0x1], 1 }

</bundles_post_ra>
